<compile_context>
chip_gen: v6e
topology: v6e:2x2x1
jax: 0.10.0
libtpu: 0.0.40
codegen_flags: <defaults>
</compile_context>

<pallas_src>
import jax
import jax.numpy as jnp
from jax.experimental import pallas as pl
from jax.experimental.pallas import tpu as pltpu


def _vmem_limit(resident_bytes):
    # Explicit scoped-VMEM limit sized from the resident set (with margin for
    # double-buffering and compiler temps), clamped to stay within v7x physical.
    return int(min(max(4 * resident_bytes, 8 * 1024 * 1024), 64 * 1024 * 1024))


# ----------------------------------------------------------------------------
# Kernel 1: fused conv stack + BiLSTM input->gate projections (per batch elem)
# ----------------------------------------------------------------------------
def conv_proj_kernel(x_ref, w_ref, scale_ref, shift_ref, wi_ref, bi_ref,
                     gxf_ref, gxb_ref, buf_ref):
    # x_ref:     (1, T, C)    f32   one batch element, time-major
    # w_ref:     (L, K*C, C)  bf16  conv weights, K taps folded into the rows
    # scale_ref: (L, 1, C)    f32   fused BN scale = gamma / sqrt(var + eps)
    # shift_ref: (L, 1, C)    f32   fused BN shift = beta - mean * scale
    # wi_ref:    (C, 8H)      bf16  [W_ih_fwd | W_ih_bwd] input->gate weights
    # bi_ref:    (1, 8H)      f32   [b_fwd | b_bwd]  (b_ih + b_hh per direction)
    # gxf_ref:   (1, T, 4H)   f32   forward-direction pre-projected gates
    # gxb_ref:   (1, T, 4H)   f32   backward-direction pre-projected gates
    # buf_ref:   (T+K-1, C)   f32   VMEM halo buffer
    L, KC, C = w_ref.shape
    T = x_ref.shape[1]
    K = KC // C
    pad = (K - 1) // 2
    G = gxf_ref.shape[2]

    # Zero only the halo rows (cheap: 2*pad rows), every grid step -- the
    # interior is always overwritten below.  (No program_id==0 guard: under
    # megacore sharding each core has its own scratch instance.)
    if pad > 0:
        buf_ref[0:pad, :] = jnp.zeros((pad, C), buf_ref.dtype)
    if K - 1 - pad > 0:
        buf_ref[pad + T:, :] = jnp.zeros((K - 1 - pad, C), buf_ref.dtype)

    buf_ref[pad:pad + T, :] = x_ref[0]

    y = None
    for layer in range(L):                            # static unroll over layers
        # Fold the K taps into a single MXU dot: lane-concatenate the K shifted
        # activation windows once per layer -> (T, K*C), bf16 operands.
        taps = jnp.concatenate(
            [buf_ref[k:k + T, :] for k in range(K)], axis=-1
        ).astype(w_ref.dtype)                                     # (T, K*C) bf16
        acc = jnp.dot(taps, w_ref[layer],
                      preferred_element_type=jnp.float32)         # (T, C) f32
        y = jnp.maximum(acc * scale_ref[layer] + shift_ref[layer], 0.0)
        # TODO(synk): dropout(p=0.5) is identity here (eval / self.training ==
        # False); training-mode dropout would need pltpu PRNG masks.
        if layer + 1 < L:
            buf_ref[pad:pad + T, :] = y

    # BiLSTM input->gate projections fused here while y is resident in VMEM:
    # one (T, C) x (C, 8H) bf16 dot covers both directions, f32 accumulate.
    gx = jnp.dot(y.astype(wi_ref.dtype), wi_ref[...],
                 preferred_element_type=jnp.float32) + bi_ref[...]  # (T, 8H)
    gxf_ref[0] = gx[:, 0:G]
    gxb_ref[0] = gx[:, G:2 * G]


def conv_proj(x_btc, w_all, scale_all, shift_all, w_i, b_i):
    B, T, C = x_btc.shape
    L, KC, _ = w_all.shape
    K = KC // C
    G = w_i.shape[1] // 2
    resident = (T * C * 4                      # x block
                + L * KC * C * 2               # bf16 conv weights
                + 2 * L * C * 4                # BN scale/shift
                + C * 2 * G * 2 + 2 * G * 4    # lstm input weights / bias
                + 2 * T * G * 4                # gx output blocks
                + (T + K - 1) * C * 4)         # halo scratch
    return pl.pallas_call(
        conv_proj_kernel,
        out_shape=(jax.ShapeDtypeStruct((B, T, G), jnp.float32),
                   jax.ShapeDtypeStruct((B, T, G), jnp.float32)),
        grid=(B,),
        in_specs=[
            pl.BlockSpec((1, T, C), lambda b: (b, 0, 0)),
            pl.BlockSpec((L, KC, C), lambda b: (0, 0, 0)),
            pl.BlockSpec((L, 1, C), lambda b: (0, 0, 0)),
            pl.BlockSpec((L, 1, C), lambda b: (0, 0, 0)),
            pl.BlockSpec((C, 2 * G), lambda b: (0, 0)),
            pl.BlockSpec((1, 2 * G), lambda b: (0, 0)),
        ],
        out_specs=(pl.BlockSpec((1, T, G), lambda b: (b, 0, 0)),
                   pl.BlockSpec((1, T, G), lambda b: (b, 0, 0))),
        scratch_shapes=[pltpu.VMEM((T + K - 1, C), jnp.float32)],
        compiler_params=pltpu.CompilerParams(
            dimension_semantics=("parallel",),
            vmem_limit_bytes=_vmem_limit(resident)),
    )(x_btc, w_all, scale_all, shift_all, w_i, b_i)


# ----------------------------------------------------------------------------
# Kernel 2: bidirectional LSTM recurrence (batched over B, fwd/bwd interleaved)
# ----------------------------------------------------------------------------
def bilstm_recur_kernel(gxf_in, gxb_in, lens_ref, whf_ref, whb_ref,
                        o_ref, gxf_ref, gxb_ref, of_ref, ob_ref):
    # gxf_in/gxb_in: (B, T, 4H) f32  pre-projected gates from conv_proj
    # lens_ref:      (B, 1)     i32  sequence lengths
    # whf/whb_ref:   (H, 4H)    f32  hidden->gate weights per direction
    # o_ref:         (B, T, 2H) f32  [:, :, :H]=fwd, [:, :, H:]=bwd, pads = 0
    # gxf/gxb_ref:   (T, B, 4H) f32  scratch: time-major gates (per-t contiguous)
    # of/ob_ref:     (T, B, H)  f32  scratch: per-direction outputs
    B, T, _ = gxf_in.shape
    H = whf_ref.shape[0]
    lens = lens_ref[...]                                       # (B, 1) i32

    # One-shot relayout so every recurrence step reads one contiguous (B, 4H)
    # tile; rides the otherwise-idle XLU, no masked traffic in the loop.
    gxf_ref[...] = pltpu.einshape("btg->tbg", gxf_in[...])
    gxb_ref[...] = pltpu.einshape("btg->tbg", gxb_in[...])

    def gates_to_hc(gates, c):
        i = jax.nn.sigmoid(gates[:, 0 * H:1 * H])
        f = jax.nn.sigmoid(gates[:, 1 * H:2 * H])
        g = jnp.tanh(gates[:, 2 * H:3 * H])
        o = jax.nn.sigmoid(gates[:, 3 * H:4 * H])
        c_new = f * c + i * g
        return o * jnp.tanh(c_new), c_new

    def body(s, carry):
        hf, cf, hb, cb = carry
        tb = T - 1 - s
        # Two independent recurrences advanced together: the forward chain's
        # MXU/EUP work hides the backward chain's latency and vice versa.
        gf = gxf_ref[pl.ds(s, 1)][0] + jnp.dot(
            hf, whf_ref[...], preferred_element_type=jnp.float32)
        gb = gxb_ref[pl.ds(tb, 1)][0] + jnp.dot(
            hb, whb_ref[...], preferred_element_type=jnp.float32)
        hf_new, cf_new = gates_to_hc(gf, cf)
        hb_new, cb_new = gates_to_hc(gb, cb)
        vf = lens > s                                          # (B, 1)
        vb = lens > tb
        hf = jnp.where(vf, hf_new, hf)
        cf = jnp.where(vf, cf_new, cf)
        hb = jnp.where(vb, hb_new, hb)
        cb = jnp.where(vb, cb_new, cb)
        # Full-tile (1, B, H) scratch stores -- no lane-masked writes on the
        # serial critical path.
        of_ref[pl.ds(s, 1)] = jnp.where(vf, hf, 0.0)[None]
        ob_ref[pl.ds(tb, 1)] = jnp.where(vb, hb, 0.0)[None]
        return hf, cf, hb, cb

    z = jnp.zeros((B, H), jnp.float32)
    jax.lax.fori_loop(0, T, body, (z, z, z, z), unroll=2)

    # Single bulk writeback of the (B, T, 2H) output (two lane-slice stores).
    o_ref[:, :, 0:H] = pltpu.einshape("tbh->bth", of_ref[...]).astype(o_ref.dtype)
    o_ref[:, :, H:2 * H] = pltpu.einshape("tbh->bth", ob_ref[...]).astype(o_ref.dtype)


def bilstm_recur(gxf, gxb, input_lengths, whf, whb):
    B, T, G = gxf.shape
    H = whf.shape[0]
    lens = input_lengths.reshape(B, 1).astype(jnp.int32)
    resident = (2 * B * T * G * 4              # gx inputs
                + 2 * H * G * 4                # hidden->gate weights
                + B * T * 2 * H * 4            # output
                + 2 * T * B * G * 4            # time-major gate scratch
                + 2 * T * B * H * 4)           # per-direction output scratch
    return pl.pallas_call(
        bilstm_recur_kernel,
        out_shape=jax.ShapeDtypeStruct((B, T, 2 * H), jnp.float32),
        grid=(1,),
        in_specs=[
            pl.BlockSpec((B, T, G), lambda i: (0, 0, 0)),
            pl.BlockSpec((B, T, G), lambda i: (0, 0, 0)),
            pl.BlockSpec((B, 1), lambda i: (0, 0)),
            pl.BlockSpec((H, G), lambda i: (0, 0)),
            pl.BlockSpec((H, G), lambda i: (0, 0)),
        ],
        out_specs=pl.BlockSpec((B, T, 2 * H), lambda i: (0, 0, 0)),
        scratch_shapes=[pltpu.VMEM((T, B, G), jnp.float32),
                        pltpu.VMEM((T, B, G), jnp.float32),
                        pltpu.VMEM((T, B, H), jnp.float32),
                        pltpu.VMEM((T, B, H), jnp.float32)],
        compiler_params=pltpu.CompilerParams(
            dimension_semantics=("arbitrary",),
            vmem_limit_bytes=_vmem_limit(resident)),
    )(gxf, gxb, lens, whf, whb)


# ----------------------------------------------------------------------------
# Encoder forward (inference / eval mode)
# ----------------------------------------------------------------------------
def encoder_forward(x_bct, input_lengths, params):
    w_all, scale_all, shift_all, w_i, b_i = params["conv_proj"]
    whf, whb = params["lstm_hh"]
    # NCL -> NLC once (time-major for both kernels).
    # TODO(synk): this transpose could also be folded into the conv kernel as
    # an in-VMEM XLU transpose to save one HBM pass over x.
    x_btc = jnp.transpose(x_bct, (0, 2, 1))
    gxf, gxb = conv_proj(x_btc, w_all, scale_all, shift_all, w_i, b_i)
    return bilstm_recur(gxf, gxb, input_lengths, whf, whb)


# ----------------------------------------------------------------------------
# Deterministic synthetic parameters (no checkpoint load)
# ----------------------------------------------------------------------------
def make_params(key, n_convs, C, K):
    H = C // 2
    eps = 1e-5
    w_rows, scale_list, shift_list = [], [], []
    for i in range(n_convs):
        kw, kg, kb, km, kv = jax.random.split(jax.random.fold_in(key, i), 5)
        w = 0.1 * jax.random.normal(kw, (C, C, K), jnp.float32)   # (out, in, K)
        gamma = 1.0 + 0.1 * jax.random.normal(kg, (C,), jnp.float32)
        beta = 0.1 * jax.random.normal(kb, (C,), jnp.float32)
        run_mean = 0.1 * jax.random.normal(km, (C,), jnp.float32)
        run_var = 1.0 + 0.05 * jax.random.uniform(kv, (C,), jnp.float32)
        scale = gamma / jnp.sqrt(run_var + eps)
        shift = beta - run_mean * scale
        # (out, in, K) -> (K, in, out) -> (K*in, out): tap-major rows to match
        # the in-kernel lane-concatenation of the K shifted activations.
        w_rows.append(jnp.transpose(w, (2, 1, 0)).reshape(K * C, C))
        scale_list.append(scale.reshape(1, C))
        shift_list.append(shift.reshape(1, C))
    w_all = jnp.stack(w_rows).astype(jnp.bfloat16)      # (L, K*C, C) bf16
    scale_all = jnp.stack(scale_list)                   # (L, 1, C)   f32
    shift_all = jnp.stack(shift_list)                   # (L, 1, C)   f32

    kl = jax.random.fold_in(key, 1000)
    k1, k2, k3, k4, k5, k6, k7, k8 = jax.random.split(kl, 8)
    # PyTorch LSTM layout: weight_ih (4H, C), weight_hh (4H, H), gate order
    # i, f, g, o; biases folded as b_ih + b_hh.
    w_ih_f = 0.1 * jax.random.normal(k1, (4 * H, C), jnp.float32)
    w_hh_f = 0.1 * jax.random.normal(k2, (4 * H, H), jnp.float32)
    b_f = (0.1 * jax.random.normal(k3, (4 * H,), jnp.float32)
           + 0.1 * jax.random.normal(k4, (4 * H,), jnp.float32))
    w_ih_b = 0.1 * jax.random.normal(k5, (4 * H, C), jnp.float32)
    w_hh_b = 0.1 * jax.random.normal(k6, (4 * H, H), jnp.float32)
    b_b = (0.1 * jax.random.normal(k7, (4 * H,), jnp.float32)
           + 0.1 * jax.random.normal(k8, (4 * H,), jnp.float32))
    w_i = jnp.concatenate([w_ih_f.T, w_ih_b.T], axis=1).astype(jnp.bfloat16)
    b_i = jnp.concatenate([b_f, b_b]).reshape(1, 8 * H)
    return {"conv_proj": (w_all, scale_all, shift_all, w_i, b_i),
            "lstm_hh": (w_hh_f.T, w_hh_b.T)}


if __name__ == "__main__":
    B = 8                 # batch
    C = 32                # encoder_embedding_dim
    T = 16                # max sequence length
    K = 5                 # encoder_kernel_size
    N_CONVS = 3           # encoder_n_convolutions

    key = jax.random.PRNGKey(0)
    kx, kp = jax.random.split(key)
    x = jax.random.normal(kx, (B, C, T), jnp.float32)              # (B, C, T)
    input_lengths = jnp.array([16, 15, 13, 11, 9, 8, 5, 3], jnp.int32)
    params = make_params(kp, N_CONVS, C, K)

    out = encoder_forward(x, input_lengths, params)                # (B, T, C)
    out = jax.block_until_ready(out)
    assert out.shape == (B, T, C)
    print("KERNEL_OK")
</pallas_src>

<mosaic_0001>
module attributes {stable_mosaic.version = 11 : i64} {
  func.func @conv_proj_kernel(%arg0: i32, %arg1: memref<1x16x32xf32, #tpu.memory_space<vmem>>, %arg2: memref<3x160x32xbf16, #tpu.memory_space<vmem>>, %arg3: memref<3x1x32xf32, #tpu.memory_space<vmem>>, %arg4: memref<3x1x32xf32, #tpu.memory_space<vmem>>, %arg5: memref<32x128xbf16, #tpu.memory_space<vmem>>, %arg6: memref<1x128xf32, #tpu.memory_space<vmem>>, %arg7: memref<1x16x64xf32, #tpu.memory_space<vmem>>, %arg8: memref<1x16x64xf32, #tpu.memory_space<vmem>>, %arg9: memref<20x32xf32, #tpu.memory_space<vmem>>) attributes {dimension_semantics = [#tpu.dimension_semantics<parallel>], iteration_bounds = array<i64: 8>, scalar_prefetch = 0 : i64, scratch_operands = 1 : i64, tpu.core_type = #tpu.core_type<tc>, window_params = [{transform_indices = @transform_0, window_bounds = array<i64: 1, 16, 32>}, {pipeline_mode = #tpu.pipeline_mode<synchronous>, transform_indices = @transform_1, window_bounds = array<i64: 3, 160, 32>}, {pipeline_mode = #tpu.pipeline_mode<synchronous>, transform_indices = @transform_2, window_bounds = array<i64: 3, 1, 32>}, {pipeline_mode = #tpu.pipeline_mode<synchronous>, transform_indices = @transform_3, window_bounds = array<i64: 3, 1, 32>}, {pipeline_mode = #tpu.pipeline_mode<synchronous>, transform_indices = @transform_4, window_bounds = array<i64: 32, 128>}, {pipeline_mode = #tpu.pipeline_mode<synchronous>, transform_indices = @transform_5, window_bounds = array<i64: 1, 128>}, {transform_indices = @transform_6, window_bounds = array<i64: 1, 16, 64>}, {transform_indices = @transform_7, window_bounds = array<i64: 1, 16, 64>}]} {
    %cst = arith.constant 0.000000e+00 : f32
    %0 = vector.broadcast %cst : f32 to vector<2x32xf32>
    %c0 = arith.constant 0 : index
    %c0_0 = arith.constant 0 : index
    %1 = vector.load %arg9[%c0, %c0_0] : memref<20x32xf32, #tpu.memory_space<vmem>>, vector<2x32xf32>
    tpu.vector_store %arg9[%c0, %c0_0], %0 {strides = array<i32>} : memref<20x32xf32, #tpu.memory_space<vmem>>, vector<2x32xf32>,
    %cst_1 = arith.constant 0.000000e+00 : f32
    %2 = vector.broadcast %cst_1 : f32 to vector<2x32xf32>
    %c18 = arith.constant 18 : index
    %c0_2 = arith.constant 0 : index
    %3 = vector.load %arg9[%c18, %c0_2] : memref<20x32xf32, #tpu.memory_space<vmem>>, vector<2x32xf32>
    tpu.vector_store %arg9[%c18, %c0_2], %2 {strides = array<i32>} : memref<20x32xf32, #tpu.memory_space<vmem>>, vector<2x32xf32>,
    %c0_3 = arith.constant 0 : index
    %c0_4 = arith.constant 0 : index
    %c0_5 = arith.constant 0 : index
    %4 = vector.load %arg1[%c0_3, %c0_4, %c0_5] : memref<1x16x32xf32, #tpu.memory_space<vmem>>, vector<1x16x32xf32>
    %5 = vector.shape_cast %4 : vector<1x16x32xf32> to vector<16x32xf32>
    %c2 = arith.constant 2 : index
    %c0_6 = arith.constant 0 : index
    %6 = vector.load %arg9[%c2, %c0_6] : memref<20x32xf32, #tpu.memory_space<vmem>>, vector<16x32xf32>
    tpu.vector_store %arg9[%c2, %c0_6], %5 {strides = array<i32>} : memref<20x32xf32, #tpu.memory_space<vmem>>, vector<16x32xf32>,
    %c0_7 = arith.constant 0 : index
    %c0_8 = arith.constant 0 : index
    %7 = vector.load %arg9[%c0_7, %c0_8] : memref<20x32xf32, #tpu.memory_space<vmem>>, vector<16x32xf32>
    %c1 = arith.constant 1 : index
    %c0_9 = arith.constant 0 : index
    %8 = vector.load %arg9[%c1, %c0_9] : memref<20x32xf32, #tpu.memory_space<vmem>>, vector<16x32xf32>
    %c2_10 = arith.constant 2 : index
    %c0_11 = arith.constant 0 : index
    %9 = vector.load %arg9[%c2_10, %c0_11] : memref<20x32xf32, #tpu.memory_space<vmem>>, vector<16x32xf32>
    %c3 = arith.constant 3 : index
    %c0_12 = arith.constant 0 : index
    %10 = vector.load %arg9[%c3, %c0_12] : memref<20x32xf32, #tpu.memory_space<vmem>>, vector<16x32xf32>
    %c4 = arith.constant 4 : index
    %c0_13 = arith.constant 0 : index
    %11 = vector.load %arg9[%c4, %c0_13] : memref<20x32xf32, #tpu.memory_space<vmem>>, vector<16x32xf32>
    %12 = tpu.concatenate %7, %8, %9, %10, %11 in 1 : vector<16x32xf32>, vector<16x32xf32>, vector<16x32xf32>, vector<16x32xf32>, vector<16x32xf32> -> vector<16x160xf32>
    %13 = arith.truncf %12 : vector<16x160xf32> to vector<16x160xbf16>
    %c0_14 = arith.constant 0 : index
    %c0_15 = arith.constant 0 : index
    %c0_16 = arith.constant 0 : index
    %14 = vector.load %arg2[%c0_14, %c0_15, %c0_16] : memref<3x160x32xbf16, #tpu.memory_space<vmem>>, vector<1x160x32xbf16>
    %15 = vector.shape_cast %14 : vector<1x160x32xbf16> to vector<160x32xbf16>
    %cst_17 = arith.constant dense<0.000000e+00> : vector<16x32xf32>
    %16 = tpu.matmul %13, %15, %cst_17 {dimension_numbers = #tpu.dot_dimension_numbers<[1], [0], [0], [1], [0, 0, 1, 1], [], []>} : vector<16x160xbf16>, vector<160x32xbf16>, vector<16x32xf32> -> vector<16x32xf32>
    %c0_18 = arith.constant 0 : index
    %c0_19 = arith.constant 0 : index
    %c0_20 = arith.constant 0 : index
    %17 = vector.load %arg3[%c0_18, %c0_19, %c0_20] : memref<3x1x32xf32, #tpu.memory_space<vmem>>, vector<1x1x32xf32>
    %18 = vector.shape_cast %17 : vector<1x1x32xf32> to vector<1x32xf32>
    %19 = vector.broadcast %18 : vector<1x32xf32> to vector<16x32xf32>
    %20 = arith.mulf %16, %19 : vector<16x32xf32>
    %c0_21 = arith.constant 0 : index
    %c0_22 = arith.constant 0 : index
    %c0_23 = arith.constant 0 : index
    %21 = vector.load %arg4[%c0_21, %c0_22, %c0_23] : memref<3x1x32xf32, #tpu.memory_space<vmem>>, vector<1x1x32xf32>
    %22 = vector.shape_cast %21 : vector<1x1x32xf32> to vector<1x32xf32>
    %23 = vector.broadcast %22 : vector<1x32xf32> to vector<16x32xf32>
    %24 = arith.addf %20, %23 : vector<16x32xf32>
    %cst_24 = arith.constant 0.000000e+00 : f32
    %25 = vector.broadcast %cst_24 : f32 to vector<16x32xf32>
    %26 = arith.maximumf %24, %25 : vector<16x32xf32>
    %c2_25 = arith.constant 2 : index
    %c0_26 = arith.constant 0 : index
    %27 = vector.load %arg9[%c2_25, %c0_26] : memref<20x32xf32, #tpu.memory_space<vmem>>, vector<16x32xf32>
    tpu.vector_store %arg9[%c2_25, %c0_26], %26 {strides = array<i32>} : memref<20x32xf32, #tpu.memory_space<vmem>>, vector<16x32xf32>,
    %c0_27 = arith.constant 0 : index
    %c0_28 = arith.constant 0 : index
    %28 = vector.load %arg9[%c0_27, %c0_28] : memref<20x32xf32, #tpu.memory_space<vmem>>, vector<16x32xf32>
    %c1_29 = arith.constant 1 : index
    %c0_30 = arith.constant 0 : index
    %29 = vector.load %arg9[%c1_29, %c0_30] : memref<20x32xf32, #tpu.memory_space<vmem>>, vector<16x32xf32>
    %c2_31 = arith.constant 2 : index
    %c0_32 = arith.constant 0 : index
    %30 = vector.load %arg9[%c2_31, %c0_32] : memref<20x32xf32, #tpu.memory_space<vmem>>, vector<16x32xf32>
    %c3_33 = arith.constant 3 : index
    %c0_34 = arith.constant 0 : index
    %31 = vector.load %arg9[%c3_33, %c0_34] : memref<20x32xf32, #tpu.memory_space<vmem>>, vector<16x32xf32>
    %c4_35 = arith.constant 4 : index
    %c0_36 = arith.constant 0 : index
    %32 = vector.load %arg9[%c4_35, %c0_36] : memref<20x32xf32, #tpu.memory_space<vmem>>, vector<16x32xf32>
    %33 = tpu.concatenate %28, %29, %30, %31, %32 in 1 : vector<16x32xf32>, vector<16x32xf32>, vector<16x32xf32>, vector<16x32xf32>, vector<16x32xf32> -> vector<16x160xf32>
    %34 = arith.truncf %33 : vector<16x160xf32> to vector<16x160xbf16>
    %c1_37 = arith.constant 1 : index
    %c0_38 = arith.constant 0 : index
    %c0_39 = arith.constant 0 : index
    %35 = vector.load %arg2[%c1_37, %c0_38, %c0_39] : memref<3x160x32xbf16, #tpu.memory_space<vmem>>, vector<1x160x32xbf16>
    %36 = vector.shape_cast %35 : vector<1x160x32xbf16> to vector<160x32xbf16>
    %cst_40 = arith.constant dense<0.000000e+00> : vector<16x32xf32>
    %37 = tpu.matmul %34, %36, %cst_40 {dimension_numbers = #tpu.dot_dimension_numbers<[1], [0], [0], [1], [0, 0, 1, 1], [], []>} : vector<16x160xbf16>, vector<160x32xbf16>, vector<16x32xf32> -> vector<16x32xf32>
    %c1_41 = arith.constant 1 : index
    %c0_42 = arith.constant 0 : index
    %c0_43 = arith.constant 0 : index
    %38 = vector.load %arg3[%c1_41, %c0_42, %c0_43] : memref<3x1x32xf32, #tpu.memory_space<vmem>>, vector<1x1x32xf32>
    %39 = vector.shape_cast %38 : vector<1x1x32xf32> to vector<1x32xf32>
    %40 = vector.broadcast %39 : vector<1x32xf32> to vector<16x32xf32>
    %41 = arith.mulf %37, %40 : vector<16x32xf32>
    %c1_44 = arith.constant 1 : index
    %c0_45 = arith.constant 0 : index
    %c0_46 = arith.constant 0 : index
    %42 = vector.load %arg4[%c1_44, %c0_45, %c0_46] : memref<3x1x32xf32, #tpu.memory_space<vmem>>, vector<1x1x32xf32>
    %43 = vector.shape_cast %42 : vector<1x1x32xf32> to vector<1x32xf32>
    %44 = vector.broadcast %43 : vector<1x32xf32> to vector<16x32xf32>
    %45 = arith.addf %41, %44 : vector<16x32xf32>
    %cst_47 = arith.constant 0.000000e+00 : f32
    %46 = vector.broadcast %cst_47 : f32 to vector<16x32xf32>
    %47 = arith.maximumf %45, %46 : vector<16x32xf32>
    %c2_48 = arith.constant 2 : index
    %c0_49 = arith.constant 0 : index
    %48 = vector.load %arg9[%c2_48, %c0_49] : memref<20x32xf32, #tpu.memory_space<vmem>>, vector<16x32xf32>
    tpu.vector_store %arg9[%c2_48, %c0_49], %47 {strides = array<i32>} : memref<20x32xf32, #tpu.memory_space<vmem>>, vector<16x32xf32>,
    %c0_50 = arith.constant 0 : index
    %c0_51 = arith.constant 0 : index
    %49 = vector.load %arg9[%c0_50, %c0_51] : memref<20x32xf32, #tpu.memory_space<vmem>>, vector<16x32xf32>
    %c1_52 = arith.constant 1 : index
    %c0_53 = arith.constant 0 : index
    %50 = vector.load %arg9[%c1_52, %c0_53] : memref<20x32xf32, #tpu.memory_space<vmem>>, vector<16x32xf32>
    %c2_54 = arith.constant 2 : index
    %c0_55 = arith.constant 0 : index
    %51 = vector.load %arg9[%c2_54, %c0_55] : memref<20x32xf32, #tpu.memory_space<vmem>>, vector<16x32xf32>
    %c3_56 = arith.constant 3 : index
    %c0_57 = arith.constant 0 : index
    %52 = vector.load %arg9[%c3_56, %c0_57] : memref<20x32xf32, #tpu.memory_space<vmem>>, vector<16x32xf32>
    %c4_58 = arith.constant 4 : index
    %c0_59 = arith.constant 0 : index
    %53 = vector.load %arg9[%c4_58, %c0_59] : memref<20x32xf32, #tpu.memory_space<vmem>>, vector<16x32xf32>
    %54 = tpu.concatenate %49, %50, %51, %52, %53 in 1 : vector<16x32xf32>, vector<16x32xf32>, vector<16x32xf32>, vector<16x32xf32>, vector<16x32xf32> -> vector<16x160xf32>
    %55 = arith.truncf %54 : vector<16x160xf32> to vector<16x160xbf16>
    %c2_60 = arith.constant 2 : index
    %c0_61 = arith.constant 0 : index
    %c0_62 = arith.constant 0 : index
    %56 = vector.load %arg2[%c2_60, %c0_61, %c0_62] : memref<3x160x32xbf16, #tpu.memory_space<vmem>>, vector<1x160x32xbf16>
    %57 = vector.shape_cast %56 : vector<1x160x32xbf16> to vector<160x32xbf16>
    %cst_63 = arith.constant dense<0.000000e+00> : vector<16x32xf32>
    %58 = tpu.matmul %55, %57, %cst_63 {dimension_numbers = #tpu.dot_dimension_numbers<[1], [0], [0], [1], [0, 0, 1, 1], [], []>} : vector<16x160xbf16>, vector<160x32xbf16>, vector<16x32xf32> -> vector<16x32xf32>
    %c2_64 = arith.constant 2 : index
    %c0_65 = arith.constant 0 : index
    %c0_66 = arith.constant 0 : index
    %59 = vector.load %arg3[%c2_64, %c0_65, %c0_66] : memref<3x1x32xf32, #tpu.memory_space<vmem>>, vector<1x1x32xf32>
    %60 = vector.shape_cast %59 : vector<1x1x32xf32> to vector<1x32xf32>
    %61 = vector.broadcast %60 : vector<1x32xf32> to vector<16x32xf32>
    %62 = arith.mulf %58, %61 : vector<16x32xf32>
    %c2_67 = arith.constant 2 : index
    %c0_68 = arith.constant 0 : index
    %c0_69 = arith.constant 0 : index
    %63 = vector.load %arg4[%c2_67, %c0_68, %c0_69] : memref<3x1x32xf32, #tpu.memory_space<vmem>>, vector<1x1x32xf32>
    %64 = vector.shape_cast %63 : vector<1x1x32xf32> to vector<1x32xf32>
    %65 = vector.broadcast %64 : vector<1x32xf32> to vector<16x32xf32>
    %66 = arith.addf %62, %65 : vector<16x32xf32>
    %cst_70 = arith.constant 0.000000e+00 : f32
    %67 = vector.broadcast %cst_70 : f32 to vector<16x32xf32>
    %68 = arith.maximumf %66, %67 : vector<16x32xf32>
    %69 = arith.truncf %68 : vector<16x32xf32> to vector<16x32xbf16>
    %c0_71 = arith.constant 0 : index
    %c0_72 = arith.constant 0 : index
    %70 = vector.load %arg5[%c0_71, %c0_72] : memref<32x128xbf16, #tpu.memory_space<vmem>>, vector<32x128xbf16>
    %cst_73 = arith.constant dense<0.000000e+00> : vector<16x128xf32>
    %71 = tpu.matmul %69, %70, %cst_73 {dimension_numbers = #tpu.dot_dimension_numbers<[1], [0], [0], [1], [0, 0, 1, 1], [], []>} : vector<16x32xbf16>, vector<32x128xbf16>, vector<16x128xf32> -> vector<16x128xf32>
    %c0_74 = arith.constant 0 : index
    %c0_75 = arith.constant 0 : index
    %72 = vector.load %arg6[%c0_74, %c0_75] : memref<1x128xf32, #tpu.memory_space<vmem>>, vector<1x128xf32>
    %73 = vector.broadcast %72 : vector<1x128xf32> to vector<16x128xf32>
    %74 = arith.addf %71, %73 : vector<16x128xf32>
    %75 = vector.extract_strided_slice %74 {offsets = [0, 0], sizes = [16, 64], strides = [1, 1]} : vector<16x128xf32> to vector<16x64xf32>
    %c0_76 = arith.constant 0 : index
    %c0_77 = arith.constant 0 : index
    %c0_78 = arith.constant 0 : index
    %76 = vector.load %arg7[%c0_76, %c0_77, %c0_78] : memref<1x16x64xf32, #tpu.memory_space<vmem>>, vector<1x16x64xf32>
    %77 = vector.shape_cast %76 : vector<1x16x64xf32> to vector<16x64xf32>
    %78 = vector.shape_cast %75 : vector<16x64xf32> to vector<1x16x64xf32>
    tpu.vector_store %arg7[%c0_76, %c0_77, %c0_78], %78 {strides = array<i32>} : memref<1x16x64xf32, #tpu.memory_space<vmem>>, vector<1x16x64xf32>,
    %79 = vector.extract_strided_slice %74 {offsets = [0, 64], sizes = [16, 64], strides = [1, 1]} : vector<16x128xf32> to vector<16x64xf32>
    %c0_79 = arith.constant 0 : index
    %c0_80 = arith.constant 0 : index
    %c0_81 = arith.constant 0 : index
    %80 = vector.load %arg8[%c0_79, %c0_80, %c0_81] : memref<1x16x64xf32, #tpu.memory_space<vmem>>, vector<1x16x64xf32>
    %81 = vector.shape_cast %80 : vector<1x16x64xf32> to vector<16x64xf32>
    %82 = vector.shape_cast %79 : vector<16x64xf32> to vector<1x16x64xf32>
    tpu.vector_store %arg8[%c0_79, %c0_80, %c0_81], %82 {strides = array<i32>} : memref<1x16x64xf32, #tpu.memory_space<vmem>>, vector<1x16x64xf32>,
    return
  }
  func.func @transform_0(%arg0: i32) -> (i32, i32, i32) {
    %c0_i32 = arith.constant 0 : i32
    %c0_i32_0 = arith.constant 0 : i32
    %c0_i32_1 = arith.constant 0 : i32
    return %arg0, %c0_i32, %c0_i32_0 : i32, i32, i32
  }
  func.func @transform_1(%arg0: i32) -> (i32, i32, i32) {
    %c0_i32 = arith.constant 0 : i32
    %c0_i32_0 = arith.constant 0 : i32
    %c0_i32_1 = arith.constant 0 : i32
    %c0_i32_2 = arith.constant 0 : i32
    return %c0_i32, %c0_i32_0, %c0_i32_1 : i32, i32, i32
  }
  func.func @transform_2(%arg0: i32) -> (i32, i32, i32) {
    %c0_i32 = arith.constant 0 : i32
    %c0_i32_0 = arith.constant 0 : i32
    %c0_i32_1 = arith.constant 0 : i32
    %c0_i32_2 = arith.constant 0 : i32
    return %c0_i32, %c0_i32_0, %c0_i32_1 : i32, i32, i32
  }
  func.func @transform_3(%arg0: i32) -> (i32, i32, i32) {
    %c0_i32 = arith.constant 0 : i32
    %c0_i32_0 = arith.constant 0 : i32
    %c0_i32_1 = arith.constant 0 : i32
    %c0_i32_2 = arith.constant 0 : i32
    return %c0_i32, %c0_i32_0, %c0_i32_1 : i32, i32, i32
  }
  func.func @transform_4(%arg0: i32) -> (i32, i32) {
    %c0_i32 = arith.constant 0 : i32
    %c0_i32_0 = arith.constant 0 : i32
    %c0_i32_1 = arith.constant 0 : i32
    return %c0_i32, %c0_i32_0 : i32, i32
  }
  func.func @transform_5(%arg0: i32) -> (i32, i32) {
    %c0_i32 = arith.constant 0 : i32
    %c0_i32_0 = arith.constant 0 : i32
    %c0_i32_1 = arith.constant 0 : i32
    return %c0_i32, %c0_i32_0 : i32, i32
  }
  func.func @transform_6(%arg0: i32) -> (i32, i32, i32) {
    %c0_i32 = arith.constant 0 : i32
    %c0_i32_0 = arith.constant 0 : i32
    %c0_i32_1 = arith.constant 0 : i32
    return %arg0, %c0_i32, %c0_i32_0 : i32, i32, i32
  }
  func.func @transform_7(%arg0: i32) -> (i32, i32, i32) {
    %c0_i32 = arith.constant 0 : i32
    %c0_i32_0 = arith.constant 0 : i32
    %c0_i32_1 = arith.constant 0 : i32
    return %arg0, %c0_i32, %c0_i32_0 : i32, i32, i32
  }
}

</mosaic_0001>

<bundles_post_ra>
// kernel: tpu_custom_call.1
= control target key start
LH: loop header
LB: loop body
LE: loop exit
PB: predicated region body
PF: predicated region fallthrough
CT: control target
= control target key end

     0   :  { %13 = vsyncpa [#allocation4], 0  ;;  %s1806_s0 = inlined_call_operand.vmem [shape: f32[8,16,32], index: 0, kind: input, shape index: {}]   ;;  %s1807_s1 = inlined_call_operand.vmem [shape: bf16[3,160,32], index: 1, kind: input, shape index: {}]   ;;  %s1808_s2 = inlined_call_operand.vmem [shape: f32[3,1,32], index: 2, kind: input, shape index: {}]   ;;  %s1809_s3 = inlined_call_operand.vmem [shape: f32[3,1,32], index: 3, kind: input, shape index: {}]   ;;  %s1810_s4 = inlined_call_operand.vmem [shape: bf16[32,128], index: 4, kind: input, shape index: {}]   ;;  %s1811_s5 = inlined_call_operand.vmem [shape: f32[1,128], index: 5, kind: input, shape index: {}]   ;;  %s1812_s6 = inlined_call_operand.hbm [shape: f32[8,16,64], index: 6, kind: output, shape index: {0}]   ;;  %s1813_s7 = inlined_call_operand.hbm [shape: f32[8,16,64], index: 7, kind: output, shape index: {1}]  }
   0x1   :  { %15 = vsyncpa [#allocation4 + $0x1], 0 }
   0x2   :  { %16 = vsyncpa [#allocation6], 0 }
   0x3   :  { %18 = vsyncpa [#allocation6 + $0x1], 0  ;;  %s1464_s24 = smov 0   ;;  %s1466_s25 = smov 0  }
   0x4   :  { %s1468_s26 = smov 0   ;;  %s1470_s27 = smov 0  }
   0x5 LB: > { %s1485_s28 = sadd.s32 4294967295, %s1412_s27   ;;  %s1076_s29 = sadd.s32 4294967294, %s1412_s27   ;;  %s1412_s27 = sphi %s1470_s27, %s1821_s27   ;;  %s1408_s26 = sphi %s1468_s26, %s1820_s26   ;;  %s1404_s25 = sphi %s1466_s25, %s1819_s25   ;;  %s1400_s24 = sphi %s1464_s24, %s1818_s24  }
   0x6   : > { %s1489_s30 = sadd.s32 1, %s1412_s27   ;;  %s162_s8 = sadd.s32 1, %s1408_s26 }
   0x7   : > { %s159_s9 = ssub.s32 %s1412_s27, %s1489_s30  ;;  %p172_p0 = scmp.ne.s32.totalorder %s1408_s26, %s1404_s25 }
   0x8   : > { %p160_p1 = scmp.eq.s32.totalorder %s159_s9, 0  ;;  %p173_p2 = scmp.eq.s32.totalorder %s1485_s28, 7 }
   0x9   : > { %p178_p3 = scmp.ne.s32.totalorder %s1404_s25, %s1400_s24  ;;  %p179_p4 = scmp.eq.s32.totalorder %s1076_s29, 7 }
   0xa   : > { %s1500_s10 = scalar_select %p160_p1, %s1408_s26, %s162_s8  }
   0xb   : > { %p1502_p5 = por %p173_p2, %p172_p0  ;;  %p1506_p6 = por %p179_p4, %p178_p3 }
   0xc   : > { %p1079_p7 = scmp.ge.s32.totalorder %s1412_s27, 1  ;;  %p246_p8 = scmp.lt.s32.totalorder %s1412_s27, 9 }
   0xe   : > { %p247_p9 = pnand %p1079_p7, %p246_p8 }
   0xf   : > { %p283_p10 = scmp.lt.s32.totalorder (!%p247_p9), %s1485_s28, 7  ;;  %s1416_s14 = smov (!%p247_p9), 32  }
  0x10   : > { %250 = sbr.rel (%p247_p9) target bundleno = 1371 (0x55b), region = 44  ;;  %s1417_s15 = smov (!%p247_p9), 96  }
  0x11   : > { %s1418_s18 = smov (!%p247_p9), 64   ;;  %s1704_s9 = sand.u32 (!%p247_p9), 1, %s1404_s25  }
  0x12   : > { %s948_s23 = scalar_lea.sflag (!%p247_p9), [#allocation4], %s1704_s9  ;;  %s1420_s8 = smov (!%p247_p9), [#allocation3]  }
  0x15   : > { %vm289_vm0 = vcmask 254976   ;;  %v1414_v0 = vmov 0.0   ;;  %v1415_v1 = vmov 0   ;;  %s284_s13 = scalar_select %p283_p10, %s1485_s28, 7  ;;  %v1290_v2 = vld [vmem:[%s1807_s1 + $0x38] sm:$0xff]   ;;  %vm294_vm1 = vcmask 261120  }
  0x16   : > { %290 = vst.msk [vmem:[#allocation2] sm:$0x3] %vm289_vm0, %v1414_v0  ;;  %291 = vst.msk [vmem:[#allocation2 + $0x12] sm:$0x3] %vm289_vm0, %v1414_v0  ;;  %424 = vmatprep.subr.bf16.mxu0 %v1415_v1  ;;  %613 = vmatprep.subr.bf16.mxu1 %v1415_v1  ;;  %v1291_v3 = vld [vmem:[%s1807_s1 + $0x30] sm:$0xff]   ;;  %v1292_v6 = vld [vmem:[%s1807_s1 + $0x28] sm:$0xff]  }
  0x17   : > { %s1179_s16 = sshll.u32 %s284_s13, 4  ;;  %425 = vmatpush1.bf16.msra.mxu0 %v1290_v2  ;;  %v1293_v7 = vld [vmem:[%s1807_s1 + $0x20] sm:$0xff]   ;;  %v1294_v16 = vld [vmem:[%s1807_s1 + $0x18] sm:$0xff]   ;;  %v1295_v20 = vld [vmem:[%s1807_s1 + $0x10] sm:$0xff]   ;;  %vm333_vm2 = vcmask 523264   ;;  %vm336_vm3 = vcmask 785408  }
  0x18   : > { %s287_s21 = scalar_lea.vmem %s1806_s0, %s1179_s16  ;;  %426 = vmatprep.subr.bf16.mxu0 %v1415_v1  ;;  %v1296_v22 = vld [vmem:[%s1807_s1 + $0x8] sm:$0xff]   ;;  %v1297_v23 = vld [vmem:[%s1807_s1] sm:$0xff]   ;;  %v1302_v46 = vld [vmem:[%s1807_s1 + $0x78] sm:$0xff]   ;;  %vm1419_vm4 = vmmov 0   ;;  %s1080_s13 = sshll.u32 %s1704_s9, 4 }
  0x19   : > { %v292_v4 = vld [vmem:[%s287_s21] sm:$0xff]  ;;  %v293_v5 = vld [vmem:[%s287_s21 + $0x8] sm:$0xff]  ;;  %v1303_v47 = vld [vmem:[%s1807_s1 + $0x70] sm:$0xff]   ;;  %s275_s19 = scalar_lea.vmem [#allocation3], %s1080_s13  ;;  %s1326_s16 = sshll.u32 %s1420_s8, 4  ;;  %s1327_s16 = int_to_ptr.vmem [resolvable:$false] %s1326_s16 }
  0x1a   : > { %295 = vst.msk [vmem:[#allocation2 + $0x2] sm:$0xff] %vm294_vm1, %v292_v4  ;;  %296 = vst.msk [vmem:[#allocation2 + $0xa] sm:$0xff] %vm294_vm1, %v293_v5  ;;  %v1298_v24 = vld [vmem:[%s1807_s1 + $0x48] sm:$0xff]   ;;  %v1299_v25 = vld [vmem:[%s1807_s1 + $0x40] sm:$0xff]   ;;  %s1328_s17 = scalar_lea.vmem %s1327_s16, 512 }
  0x1b   : > { %427 = vmatpush1.bf16.msra.mxu0 %v1291_v3  ;;  %v1300_v44 = vld [vmem:[%s1807_s1 + $0x88] sm:$0xff]   ;;  %v1301_v45 = vld [vmem:[%s1807_s1 + $0x80] sm:$0xff]   ;;  %v1306_v50 = vld [vmem:[%s1807_s1 + $0x58] sm:$0xff]  }
  0x1c   : > { %428 = vmatprep.subr.bf16.mxu0 %v1415_v1  ;;  %614 = vmatpush1.bf16.msra.mxu1 %v1300_v44  ;;  %v1304_v48 = vld [vmem:[%s1807_s1 + $0x68] sm:$0xff]   ;;  %v1305_v49 = vld [vmem:[%s1807_s1 + $0x60] sm:$0xff]   ;;  %v1307_v51 = vld [vmem:[%s1807_s1 + $0x50] sm:$0xff]  }
  0x1d   : > { %615 = vmatprep.subr.bf16.mxu1 %v1415_v1  ;;  %v1095_v52 = vld [vmem:[%s1808_s2] ss:$0 sm:$0xff]  ;;  %v1308_v2 = vld [vmem:[%s1807_s1 + $0x98] sm:$0xff]   ;;  %v1309_v3 = vld [vmem:[%s1807_s1 + $0x90] sm:$0xff]  }
  0x1e   : > { %v1096_v54 = vld [vmem:[%s1809_s3] ss:$0 sm:$0xff]  ;;  %v1131_v44 = vld [vmem:[%s1809_s3 + $0x1] ss:$0 sm:$0xff] }
  0x1f   : > { %429 = vmatpush1.bf16.msra.mxu0 %v1292_v6 }
  0x20   : > { %430 = vmatprep.subr.bf16.mxu0 %v1415_v1  ;;  %616 = vmatpush1.bf16.msra.mxu1 %v1301_v45 }
  0x21   : > { %v299_v8 = vld [vmem:[#allocation2 + $0x1] sm:$0xff]  ;;  %v300_v9 = vld [vmem:[#allocation2 + $0x9] sm:$0xff]  ;;  %617 = vmatprep.subr.bf16.mxu1 %v1415_v1 }
  0x22   : > { %v301_v10 = vld [vmem:[#allocation2 + $0x2] sm:$0xff]  ;;  %v1245_v11 = vpack.i.bf16 %v300_v9, %v299_v8  ;;  %v302_v12 = vld [vmem:[#allocation2 + $0xa] sm:$0xff] }
  0x23   : > { %v303_v13 = vld [vmem:[#allocation2 + $0x3] sm:$0xff]  ;;  %v304_v14 = vld [vmem:[#allocation2 + $0xb] sm:$0xff]  ;;  %431 = vmatpush1.bf16.msra.mxu0 %v1293_v7  ;;  %v1250_v18 = vpack.i.bf16 %v302_v12, %v301_v10 }
  0x24   : > { %v1255_v15 = vpack.i.bf16 %v304_v14, %v303_v13  ;;  %v305_v17 = vld [vmem:[#allocation2 + $0x4] sm:$0xff]  ;;  %1246 = vrot.lane.b32.xlu0 %v1245_v11, %s1416_s14  ;;  %432 = vmatprep.subr.bf16.mxu0 %v1415_v1  ;;  %v306_v19 = vld [vmem:[#allocation2 + $0xc] sm:$0xff] }
  0x25   : > { %v340_v21 = vpack.c.bf16 %v306_v19, %v305_v17  ;;  %v297_v30 = vld [vmem:[#allocation2] sm:$0xff]  ;;  %v298_v31 = vld [vmem:[#allocation2 + $0x8] sm:$0xff]  ;;  %618 = vmatpush1.bf16.msra.mxu1 %v1302_v46 }
  0x26   : > { %1256 = vrot.lane.b32.xlu1 %v1255_v15, %s1417_s15  ;;  %619 = vmatprep.subr.bf16.mxu1 %v1415_v1 }
  0x27   : > { %433 = vmatpush1.bf16.msra.mxu0 %v1294_v16  ;;  %1094 = vmatprep.mubr.msk.bf16.mxu0 %vm294_vm1, %v340_v21 }
  0x28   : > { %1251 = vrot.lane.b32.xlu0 %v1250_v18, %s1418_s18  ;;  %434 = vmatprep.subr.bf16.mxu0 %v1415_v1 }
  0x29   : > { %620 = vmatpush1.bf16.msra.mxu1 %v1303_v47 }
  0x2a   : > { %621 = vmatprep.subr.bf16.mxu1 %v1415_v1 }
  0x2b   : > { %435 = vmatpush1.bf16.msra.mxu0 %v1295_v20 }
  0x2c   : > { %436 = vmatprep.subr.bf16.mxu0 %v1415_v1 }
  0x2d   : > { %622 = vmatpush1.bf16.msra.mxu1 %v1304_v48 }
  0x2e   : > { %623 = vmatprep.subr.bf16.mxu1 %v1415_v1 }
  0x2f   : > { %437 = vmatpush1.bf16.msra.mxu0 %v1296_v22 }
  0x30   : > { %438 = vmatprep.subr.bf16.mxu0 %v1415_v1 }
  0x31   : > { %624 = vmatpush1.bf16.msra.mxu1 %v1305_v49 }
  0x32   : > { %625 = vmatprep.subr.bf16.mxu1 %v1415_v1 }
  0x33   : > { %439 = vmatpush1.bf16.msra.mxu0 %v1297_v23 }
  0x34   : > { %452 = vmatprep.subr.bf16.mxu0 %v1415_v1 }
  0x35   : > { %626 = vmatpush1.bf16.msra.mxu1 %v1306_v50 }
  0x36   : > { %627 = vmatprep.subr.bf16.mxu1 %v1415_v1 }
  0x37   : > { %453 = vmatpush2.bf16.msra.mxu0 %v1298_v24 }
  0x38   : > { %454 = vmatprep.subr.bf16.mxu0 %v1415_v1 }
  0x39   : > { %628 = vmatpush1.bf16.msra.mxu1 %v1307_v51 }
  0x3a   : > { %641 = vmatprep.subr.bf16.mxu1 %v1415_v1 }
  0x3b   : > { %455 = vmatpush2.bf16.msra.mxu0 %v1299_v25 }
  0x3c   : > { %804 = vmatprep.subr.bf16.mxu0 %v1415_v1 }
  0x3d   : > { %642 = vmatpush2.bf16.msra.mxu1 %v1308_v2 }
  0x3e   : > { %643 = vmatprep.subr.bf16.mxu1 %v1415_v1 }
  0x41   : > { %644 = vmatpush2.bf16.msra.mxu1 %v1309_v3 }
  0x42   : > { %1185 = vmatprep.subr.bf16.mxu1 %v1414_v0 }
  0x96   : > { %v1247_v26 = vpop.permute.xlu0 %1246 }
  0x97   : > { %v1249_v28 = vunpack.i.h.bf16 %v1247_v26  ;;  %v1248_v29 = vunpack.i.l.bf16 %v1247_v26 }
  0x98   : > { %v1257_v27 = vpop.permute.xlu1 %1256 }
  0x99   : > { %v1259_v33 = vunpack.i.h.bf16 %v1257_v27  ;;  %v1258_v34 = vunpack.i.l.bf16 %v1257_v27  ;;  %v331_v37 = vsel %vm294_vm1, %v297_v30, %v1248_v29  ;;  %v332_v38 = vsel %vm294_vm1, %v298_v31, %v1249_v28 }
  0x9a   : > { %v1252_v32 = vpop.permute.xlu0 %1251 }
  0x9b   : > { %v1254_v35 = vunpack.i.h.bf16 %v1252_v32  ;;  %v1253_v36 = vunpack.i.l.bf16 %v1252_v32 }
  0x9d   : > { %v334_v39 = vsel %vm333_vm2, %v331_v37, %v1253_v36  ;;  %v335_v40 = vsel %vm333_vm2, %v332_v38, %v1254_v35  ;;  %v1311_v35 = vld [vmem:[%s1807_s1 + $0xd0] sm:$0xff]   ;;  %v1312_v36 = vld [vmem:[%s1807_s1 + $0xc8] sm:$0xff]   ;;  %v1313_v37 = vld [vmem:[%s1807_s1 + $0xc0] sm:$0xff]  }
  0x9e   : > { %v337_v41 = vsel %vm336_vm3, %v334_v39, %v1258_v34  ;;  %v338_v42 = vsel %vm336_vm3, %v335_v40, %v1259_v33  ;;  %v1310_v34 = vld [vmem:[%s1807_s1 + $0xd8] sm:$0xff]   ;;  %v1315_v39 = vld [vmem:[%s1807_s1 + $0xb0] sm:$0xff]   ;;  %v1316_v40 = vld [vmem:[%s1807_s1 + $0xa8] sm:$0xff]  }
  0x9f   : > { %v339_v43 = vpack.c.bf16 %v338_v42, %v337_v41  ;;  %v1314_v38 = vld [vmem:[%s1807_s1 + $0xb8] sm:$0xff]   ;;  %v1317_v41 = vld [vmem:[%s1807_s1 + $0xa0] sm:$0xff]  }
  0xa0   : > { %v1129_v42 = vld [vmem:[%s1808_s2 + $0x1] ss:$0 sm:$0xff] }
  0xa1   : > { %457 = vmatmul.mubr.bf16.vlgmr.msra.gmra.mxu0 %v339_v43 }
  0xa2   : > { %805 = vmatpush1.bf16.msra.mxu0 %v1310_v34 }
  0xa3   : > { %806 = vmatprep.subr.bf16.mxu0 %v1415_v1 }
  0xa6   : > { %807 = vmatpush1.bf16.msra.mxu0 %v1311_v35 }
  0xa7   : > { %808 = vmatprep.subr.bf16.mxu0 %v1415_v1 }
  0xaa   : > { %809 = vmatpush1.bf16.msra.mxu0 %v1312_v36 }
  0xab   : > { %810 = vmatprep.subr.bf16.mxu0 %v1415_v1 }
  0xae   : > { %811 = vmatpush1.bf16.msra.mxu0 %v1313_v37  ;;  %v1167_v37 = vld [vmem:[%s1811_s5] ss:$0 sm:$0xff] }
  0xaf   : > { %812 = vmatprep.subr.bf16.mxu0 %v1415_v1 }
  0xb2   : > { %813 = vmatpush1.bf16.msra.mxu0 %v1314_v38 }
  0xb3   : > { %814 = vmatprep.subr.bf16.mxu0 %v1415_v1 }
  0xb6   : > { %815 = vmatpush1.bf16.msra.mxu0 %v1315_v39 }
  0xb7   : > { %816 = vmatprep.subr.bf16.mxu0 %v1415_v1 }
  0xba   : > { %817 = vmatpush1.bf16.msra.mxu0 %v1316_v40 }
  0xbb   : > { %818 = vmatprep.subr.bf16.mxu0 %v1415_v1 }
  0xbe   : > { %819 = vmatpush1.bf16.msra.mxu0 %v1317_v41 }
  0xbf   : > { %832 = vmatprep.subr.bf16.mxu0 %v1415_v1 }
 0x161   : > { %v458_v53 = vpop.f32.mrf.mxu0 }
 0x162   : > { %v472_v55 = vmul.f32 %v1095_v52, %v458_v53 }
 0x163   : > { %v460_v56 = vpop.f32.mrf.mxu0 }
 0x164   : > { %v481_v57 = vadd.f32 %v1096_v54, %v472_v55  ;;  %v1319_v55 = vld [vmem:[%s1807_s1 + $0xe0] sm:$0xff]  }
 0x165   : > { %v461_v58 = vpop.f32.mrf.mxu0 }
 0x166   : > { %v483_v59 = vmax.f32 %v481_v57, 0.0  ;;  %v473_v60 = vmul.f32 %v1095_v52, %v461_v58 }
 0x167   : > { %v463_v61 = vpop.f32.mrf.mxu0 }
 0x168   : > { %485 = vst.msk [vmem:[#allocation2 + $0x2] sm:$0xff] %vm294_vm1, %v483_v59  ;;  %v482_v62 = vadd.f32 %v1096_v54, %v473_v60  ;;  %v1318_v54 = vld [vmem:[%s1807_s1 + $0xe8] sm:$0xff]  }
 0x169   : > { %833 = vmatpush2.bf16.msra.mxu0 %v1318_v54 }
 0x16a   : > { %v484_v63 = vmax.f32 %v482_v62, 0.0  ;;  %834 = vmatprep.subr.bf16.mxu0 %v1415_v1 }
 0x16c   : > { %486 = vst.msk [vmem:[#allocation2 + $0xa] sm:$0xff] %vm294_vm1, %v484_v63 }
 0x16d   : > { %835 = vmatpush2.bf16.msra.mxu0 %v1319_v55 }
 0x16f   : > { %v491_v4 = vld [vmem:[#allocation2 + $0x2] sm:$0xff] }
 0x170   : > { %v489_v10 = vld [vmem:[#allocation2 + $0x1] sm:$0xff] }
 0x171   : > { %v487_v22 = vld [vmem:[#allocation2] sm:$0xff] }
 0x173   : > { %v495_v5 = vld [vmem:[#allocation2 + $0x4] sm:$0xff]  ;;  %v496_v6 = vld [vmem:[#allocation2 + $0xc] sm:$0xff] }
 0x174   : > { %v492_v7 = vld [vmem:[#allocation2 + $0xa] sm:$0xff]  ;;  %v528_v8 = vpack.c.bf16 %v496_v6, %v495_v5 }
 0x175   : > { %v1265_v9 = vpack.i.bf16 %v492_v7, %v491_v4  ;;  %v490_v11 = vld [vmem:[#allocation2 + $0x9] sm:$0xff] }
 0x176   : > { %v1260_v12 = vpack.i.bf16 %v490_v11, %v489_v10  ;;  %1127 = vmatprep.mubr.msk.bf16.mxu1 %vm294_vm1, %v528_v8  ;;  %v493_v13 = vld [vmem:[#allocation2 + $0x3] sm:$0xff]  ;;  %v494_v14 = vld [vmem:[#allocation2 + $0xb] sm:$0xff] }
 0x177   : > { %1266 = vrot.lane.b32.xlu0 %v1265_v9, %s1418_s18  ;;  %v1270_v15 = vpack.i.bf16 %v494_v14, %v493_v13  ;;  %v488_v23 = vld [vmem:[#allocation2 + $0x8] sm:$0xff] }
 0x178   : > { %1261 = vrot.lane.b32.xlu1 %v1260_v12, %s1416_s14 }
 0x17c   : > { %1271 = vrot.lane.b32.xlu1 %v1270_v15, %s1417_s15 }
 0x1e9   : > { %v1267_v16 = vpop.permute.xlu0 %1266 }
 0x1ea   : > { %v1262_v17 = vpop.permute.xlu1 %1261  ;;  %v1269_v20 = vunpack.i.h.bf16 %v1267_v16  ;;  %v1268_v21 = vunpack.i.l.bf16 %v1267_v16 }
 0x1eb   : > { %v1264_v18 = vunpack.i.h.bf16 %v1262_v17  ;;  %v1263_v19 = vunpack.i.l.bf16 %v1262_v17 }
 0x1ed   : > { %v521_v24 = vsel %vm294_vm1, %v487_v22, %v1263_v19  ;;  %v522_v25 = vsel %vm294_vm1, %v488_v23, %v1264_v18  ;;  %v1320_v23 = vld [vmem:[%s1810_s4 + $0x8] sm:$0xff]  }
 0x1ee   : > { %v1272_v26 = vpop.permute.xlu1 %1271  ;;  %v523_v29 = vsel %vm333_vm2, %v521_v24, %v1268_v21  ;;  %v524_v30 = vsel %vm333_vm2, %v522_v25, %v1269_v20  ;;  %v1321_v24 = vld [vmem:[%s1810_s4] sm:$0xff]  }
 0x1ef   : > { %v1274_v27 = vunpack.i.h.bf16 %v1272_v26  ;;  %v1273_v28 = vunpack.i.l.bf16 %v1272_v26  ;;  %v1164_v25 = vld [vmem:[%s1808_s2 + $0x2] ss:$0 sm:$0xff] }
 0x1f1   : > { %v525_v31 = vsel %vm336_vm3, %v523_v29, %v1273_v28  ;;  %v526_v32 = vsel %vm336_vm3, %v524_v30, %v1274_v27  ;;  %v1166_v28 = vld [vmem:[%s1809_s3 + $0x2] ss:$0 sm:$0xff] }
 0x1f2   : > { %v527_v33 = vpack.c.bf16 %v526_v32, %v525_v31 }
 0x1f4   : > { %646 = vmatmul.mubr.bf16.vlgmr.msra.gmra.mxu1 %v527_v33 }
 0x1f5   : > { %1186 = vmatpush3.bf16.msra.mxu1 %v1320_v23  ;;  %1189 = vmatprep.mubr.msk.bf16.mxu1 %vm1419_vm4, %v1414_v0 }
 0x1f6   : > { %1187 = vmatprep.subr.bf16.mxu1 %v1414_v0 }
 0x1f9   : > { %1188 = vmatpush3.bf16.msra.mxu1 %v1321_v24 }
 0x2b4   : > { %v647_v43 = vpop.f32.mrf.mxu1 }
 0x2b5   : > { %v662_v45 = vmul.f32 %v1129_v42, %v647_v43 }
 0x2b6   : > { %v649_v46 = vpop.f32.mrf.mxu1 }
 0x2b7   : > { %v672_v47 = vadd.f32 %v1131_v44, %v662_v45 }
 0x2b8   : > { %v650_v48 = vpop.f32.mrf.mxu1 }
 0x2b9   : > { %v674_v49 = vmax.f32 %v672_v47, 0.0  ;;  %v663_v50 = vmul.f32 %v1129_v42, %v650_v48 }
 0x2ba   : > { %v652_v51 = vpop.f32.mrf.mxu1 }
 0x2bb   : > { %676 = vst.msk [vmem:[#allocation2 + $0x2] sm:$0xff] %vm294_vm1, %v674_v49  ;;  %v673_v52 = vadd.f32 %v1131_v44, %v663_v50 }
 0x2bd   : > { %v675_v53 = vmax.f32 %v673_v52, 0.0 }
 0x2bf   : > { %677 = vst.msk [vmem:[#allocation2 + $0xa] sm:$0xff] %vm294_vm1, %v675_v53 }
 0x2c2   : > { %v682_v56 = vld [vmem:[#allocation2 + $0x2] sm:$0xff] }
 0x2c3   : > { %v680_v62 = vld [vmem:[#allocation2 + $0x1] sm:$0xff] }
 0x2c4   : > { %v678_v11 = vld [vmem:[#allocation2] sm:$0xff] }
 0x2c6   : > { %v686_v57 = vld [vmem:[#allocation2 + $0x4] sm:$0xff]  ;;  %v687_v58 = vld [vmem:[#allocation2 + $0xc] sm:$0xff] }
 0x2c7   : > { %v683_v59 = vld [vmem:[#allocation2 + $0xa] sm:$0xff]  ;;  %v719_v60 = vpack.c.bf16 %v687_v58, %v686_v57 }
 0x2c8   : > { %v1280_v61 = vpack.i.bf16 %v683_v59, %v682_v56  ;;  %v681_v63 = vld [vmem:[#allocation2 + $0x9] sm:$0xff] }
 0x2c9   : > { %v1275_v2 = vpack.i.bf16 %v681_v63, %v680_v62  ;;  %1162 = vmatprep.mubr.msk.bf16.mxu0 %vm294_vm1, %v719_v60  ;;  %v684_v3 = vld [vmem:[#allocation2 + $0x3] sm:$0xff]  ;;  %v685_v1 = vld [vmem:[#allocation2 + $0xb] sm:$0xff] }
 0x2ca   : > { %1281 = vrot.lane.b32.xlu1 %v1280_v61, %s1418_s18  ;;  %v1285_v4 = vpack.i.bf16 %v685_v1, %v684_v3  ;;  %v679_v12 = vld [vmem:[#allocation2 + $0x8] sm:$0xff] }
 0x2cb   : > { %1276 = vrot.lane.b32.xlu0 %v1275_v2, %s1416_s14  ;;  %s966_s14 = sshll.u32 %s275_s19, 4  ;;  %s1714_s14 = int_to_ptr.vmem [resolvable:$true] %s966_s14 }
 0x2cc   : > { %s1322_s29 = scalar_lea.vmem %s1714_s14, 256  ;;  %p1329_p0 = scmp.lt.s32.totalorder %s1714_s14, %s1327_s16 }
 0x2cd   : > { %p1323_p11 = scmp.ne.s32.totalorder %s1714_s14, %s1322_s29  ;;  %p1330_p1 = scmp.lt.s32.totalorder %s1328_s17, %s1322_s29 }
 0x2cf   : > { %1286 = vrot.lane.b32.xlu0 %v1285_v4, %s1417_s15  ;;  %s1814_s15 = sshll.u32 %s1485_s28, 8  ;;  %p1324_p12 = pnand %p1323_p11, %p1502_p5 }
 0x2d0   : > { %s1722_s22 = scalar_lea.hbm %s1812_s6, %s1814_s15  ;;  %p1331_p2 = por %p1330_p1, %p1329_p0 }
 0x2d1   : > { %p1325_p13 = pneg %p1324_p12 }
 0x2d3   : > { %p1332_p3 = pnand %p1331_p2, %p1325_p13 }
 0x33c   : > { %v1282_v5 = vpop.permute.xlu1 %1281 }
 0x33d   : > { %v1277_v6 = vpop.permute.xlu0 %1276  ;;  %v1284_v9 = vunpack.i.h.bf16 %v1282_v5  ;;  %v1283_v10 = vunpack.i.l.bf16 %v1282_v5 }
 0x33e   : > { %v1279_v7 = vunpack.i.h.bf16 %v1277_v6  ;;  %v1278_v8 = vunpack.i.l.bf16 %v1277_v6 }
 0x340   : > { %v712_v13 = vsel %vm294_vm1, %v678_v11, %v1278_v8  ;;  %v713_v14 = vsel %vm294_vm1, %v679_v12, %v1279_v7 }
 0x341   : > { %v1287_v15 = vpop.permute.xlu0 %1286  ;;  %v714_v18 = vsel %vm333_vm2, %v712_v13, %v1283_v10  ;;  %v715_v19 = vsel %vm333_vm2, %v713_v14, %v1284_v9 }
 0x342   : > { %v1289_v16 = vunpack.i.h.bf16 %v1287_v15  ;;  %v1288_v17 = vunpack.i.l.bf16 %v1287_v15 }
 0x344   : > { %v716_v20 = vsel %vm336_vm3, %v714_v18, %v1288_v17  ;;  %v717_v21 = vsel %vm336_vm3, %v715_v19, %v1289_v16 }
 0x345   : > { %v718_v22 = vpack.c.bf16 %v717_v21, %v716_v20 }
 0x347   : > { %837 = vmatmul.mubr.bf16.vlgmr.msra.gmra.mxu0 %v718_v22 }
 0x407   : > { %v838_v26 = vpop.f32.mrf.mxu0 }
 0x408   : > { %v853_v27 = vmul.f32 %v1164_v25, %v838_v26 }
 0x409   : > { %v840_v29 = vpop.f32.mrf.mxu0 }
 0x40a   : > { %v863_v31 = vadd.f32 %v1166_v28, %v853_v27 }
 0x40b   : > { %v841_v30 = vpop.f32.mrf.mxu0 }
 0x40c   : > { %v854_v32 = vmul.f32 %v1164_v25, %v841_v30  ;;  %v865_v35 = vmax.f32 %v863_v31, 0.0 }
 0x40d   : > { %v843_v33 = vpop.f32.mrf.mxu0 }
 0x40e   : > { %v864_v34 = vadd.f32 %v1166_v28, %v854_v32 }
 0x410   : > { %v866_v36 = vmax.f32 %v864_v34, 0.0 }
 0x412   : > { %v867_v0 = vpack.c.bf16 %v866_v36, %v865_v35 }
 0x414   : > { %1190 = vmatmul.mubr.msk.bf16.vlgmr.msra.gmra.mxu1 %vm294_vm1, %v867_v0 }
 0x4d4   : > { %v928_v38 = vpop.f32.mrf.mxu1 }
 0x4d5   : > { %v929_v39 = vadd.f32 %v1167_v37, %v928_v38 }
 0x4d6   : > { %v1191_v40 = vpop.f32.mrf.mxu1 }
 0x4d7   : > { %935 = vst.msk [vmem:[%s275_s19] sm:$0xff] %vm333_vm2, %v929_v39  ;;  %939 = vrot.lane.b32.xlu1 %v929_v39, %s1418_s18 }
 0x4d8   : > { %v931_v41 = vpop.f32.mrf.mxu1 }
 0x4d9   : > { %v932_v42 = vadd.f32 %v1167_v37, %v931_v41 }
 0x4da   : > { %v1192_v43 = vpop.f32.mrf.mxu1 }
 0x4db   : > { %936 = vst.msk [vmem:[%s275_s19 + $0x8] sm:$0xff] %vm333_vm2, %v932_v42  ;;  %941 = vrot.lane.b32.xlu0 %v932_v42, %s1418_s18 }
 0x4dc   : > { %1335 = shalt.err (!%p1332_p3)
}
 0x4dd   : > { %s1336_s18 = scalar_lea.hbm %s1722_s22, 256  ;;  %s1340_s21 = scalar_lea.hbm %s1812_s6, 2048 }
 0x4de   : > { %p1337_p4 = scmp.ne.s32.totalorder %s1722_s22, %s1336_s18  ;;  %p1341_p9 = scmp.lt.s32.totalorder %s1722_s22, %s1812_s6 }
 0x4df   : > { %p1342_p10 = scmp.lt.s32.totalorder %s1340_s21, %s1336_s18 }
 0x4e0   : > { %p1338_p7 = pnand %p1337_p4, %p1502_p5 }
 0x4e1   : > { %p1343_p11 = por %p1342_p10, %p1341_p9 }
 0x4e2   : > { %p1339_p8 = pneg %p1338_p7 }
 0x4e4   : > { %p1344_p12 = pnand %p1343_p11, %p1339_p8 }
 0x4e6   : > { %1347 = shalt.err (!%p1344_p12)
}
 0x4e7   : > { %s1421_s29 = smov 128   ;;  %s1422_s16 = smov 8  }
 0x4e8   : > { %1193 = dma.vmem_to_hbm [thread:$0]  (%p1502_p5), %s1714_s14, 256, %s1722_s22, %s948_s23, %s1421_s29, %s1421_s29, %s1422_s16  }
 0x4e9   : > { %s282_s15 = scalar_lea.vmem [#allocation5], %s1080_s13  ;;  %s1817_s18 = sshll.u32 %s1485_s28, 8 }
 0x4ea   : > { %s982_s17 = sshll.u32 %s282_s15, 4  ;;  %s1762_s21 = scalar_lea.hbm %s1813_s7, %s1817_s18  ;;  %s1755_s17 = int_to_ptr.vmem [resolvable:$true] %s982_s17 }
 0x4eb   : > { %s953_s14 = scalar_lea.sflag [#allocation6], %s1704_s9  ;;  %s1348_s13 = scalar_lea.vmem %s1755_s17, 256 }
 0x4ec   : > { %p1349_p13 = scmp.ne.s32.totalorder %s1755_s17, %s1348_s13  ;;  %s1423_s22 = smov [#allocation5]  }
 0x4ed   : > { %s1352_s23 = sshll.u32 %s1423_s22, 4  ;;  %s1353_s23 = int_to_ptr.vmem [resolvable:$false] %s1352_s23 }
 0x4ee   : > { %p1350_p0 = pnand %p1349_p13, %p1502_p5  ;;  %s1354_s28 = scalar_lea.vmem %s1353_s23, 512 }
 0x4ef   : > { %p1355_p2 = scmp.lt.s32.totalorder %s1755_s17, %s1353_s23  ;;  %p1356_p3 = scmp.lt.s32.totalorder %s1354_s28, %s1348_s13 }
 0x4f0   : > { %p1351_p1 = pneg %p1350_p0 }
 0x4f1   : > { %p1357_p4 = por %p1356_p3, %p1355_p2 }
 0x4f3   : > { %p1358_p7 = pnand %p1357_p4, %p1351_p1 }
 0x549   : > { %v940_v44 = vpop.permute.xlu1 %939 }
 0x54a   : > { %945 = vst.msk [vmem:[%s282_s15] sm:$0xff] %vm333_vm2, %v940_v44 }
 0x54d   : > { %v942_v45 = vpop.permute.xlu0 %941 }
 0x54e   : > { %946 = vst.msk [vmem:[%s282_s15 + $0x8] sm:$0xff] %vm333_vm2, %v942_v45 }
 0x54f   : > { %1361 = shalt.err (!%p1358_p7)
}
 0x550   : > { %s1362_s8 = scalar_lea.hbm %s1762_s21, 256  ;;  %s1366_s18 = scalar_lea.hbm %s1813_s7, 2048 }
 0x551   : > { %p1363_p8 = scmp.ne.s32.totalorder %s1762_s21, %s1362_s8  ;;  %p1367_p11 = scmp.lt.s32.totalorder %s1762_s21, %s1813_s7 }
 0x552   : > { %p1368_p12 = scmp.lt.s32.totalorder %s1366_s18, %s1362_s8 }
 0x553   : > { %p1364_p9 = pnand %p1363_p8, %p1502_p5 }
 0x554   : > { %p1369_p13 = por %p1368_p12, %p1367_p11 }
 0x555   : > { %p1365_p10 = pneg %p1364_p9 }
 0x557   : > { %p1370_p0 = pnand %p1369_p13, %p1365_p10 }
 0x559   : > { %1373 = shalt.err (!%p1370_p0)
}
 0x55a   : > { %1194 = dma.vmem_to_hbm [thread:$0]  (%p1502_p5), %s1755_s17, 256, %s1762_s21, %s953_s14, %s1421_s29, %s1421_s29, %s1422_s16  }
 0x55b PF: > { %p1204_p1 = scmp.ge.s32.totalorder %s1412_s27, 2  ;;  %s997_s13 = sand.u32 1, %s1400_s24  }
 0x55c   : > { %s998_s22 = scalar_lea.sflag [#allocation4], %s997_s13 }
 0x55d   : > { %p1198_p2 = pnand %p1204_p1, %p1506_p6 }
 0x55f   : > { %p1199_p3 = pneg %p1198_p2 }
 0x561   : > { %1391 = dma.done.wait (%p1199_p3), %s998_s22, 256  }
 0x562   : > { %1393 = vsyncadd (%p1199_p3), %s998_s22, 4294967040  ;;  %s1007_s23 = scalar_lea.sflag [#allocation6], %s997_s13 }
 0x563   : > { %1395 = dma.done.wait (%p1199_p3), %s1007_s23, 256  }
 0x564   : > { %1397 = vsyncadd (%p1199_p3), %s1007_s23, 4294967040  ;;  %p21_p5 = scmp.ge.s32.totalorder %s1489_s30, 10   ;;  %s1818_s24 = smov %s1404_s25 }
 0x565   : > { %s1819_s25 = smov %s1408_s26  ;;  %s1820_s26 = smov %s1500_s10 }
 0x566   : > { %s1821_s27 = smov %s1489_s30  ;;  %23 = sbr.rel (!%p21_p5) target bundleno = 5 (0x5), region = 102 }
 0x56b   :  { %1012 = vsyncpa [#allocation4], 1 }
 0x56c   :  { %1014 = vsyncpa [#allocation4 + $0x1], 1 }
 0x56d   :  { %1015 = vsyncpa [#allocation6], 1 }
 0x56e   :  { %1017 = vsyncpa [#allocation6 + $0x1], 1 }

</bundles_post_ra>
